<compile_context>
chip_gen: v7x
topology: tpu7x:2x2x1
jax: 0.10.0
libtpu: 0.0.40
codegen_flags: <defaults>
</compile_context>

<pallas_src>
import math

import jax
import jax.numpy as jnp
from jax.experimental import pallas as pl
from jax.experimental.pallas import tpu as pltpu

# bf16 on the MXU is native on every generation (v5e 4x128^2, v6e/v7x 2x256^2) and ~3x+
# faster than the f32 multi-pass emulation; accumulation stays f32.  Set False only if
# bit-level f32 matmul parity is required.
MATMUL_BF16 = True

# Static nonzero tap offsets used by the three depthwise convs:
#   conv0       (k=5, pad=2, dil=1): -2,-1,0,1,2
#   conv_spatial(k=7, pad=9, dil=3): -9,-6,-3,0,3,6,9
#   DDConv      (k=3, pad=1, dil=1): -1,0,1
_MASK_OFFSETS = (-9, -6, -3, -2, -1, 1, 2, 3, 6, 9)
_MASK_ROW = {s: i for i, s in enumerate(_MASK_OFFSETS)}


def _gelu_tanh(x):
    # tanh-approximate GELU: single EUP op, ~3e-4 max deviation from exact erf GELU.
    inner = 0.7978845608028654 * (x + 0.044715 * x * x * x)
    return 0.5 * x * (1.0 + jnp.tanh(inner))


def block_kernel(x_ref, masks_ref, cpar_ref, hpar_ref,
                 p1_w_ref, c1_w_ref, p2_w_ref, fc1_w_ref, fc2_w_ref,
                 out_ref):
    x = x_ref[...]               # (C, N) f32, N = B*L
    masks = masks_ref[...]       # (10, N) f32 {0,1}, one row per static tap offset
    cpar = cpar_ref[...]         # (C, 24) f32 packed per-channel params
    hpar = hpar_ref[...]         # (H, 5)  f32 packed hidden-channel params

    # --- unpack the packed parameter slabs (all static column slices) ---
    c0_w = cpar[:, 0:5]          # depthwise conv0 weights  (C,5)
    cs_w = cpar[:, 5:12]         # depthwise conv_spatial   (C,7)
    bn1_g = cpar[:, 12:13]; bn1_b = cpar[:, 13:14]
    p1_b = cpar[:, 14:15]; c0_b = cpar[:, 15:16]
    cs_b = cpar[:, 16:17]; c1_b = cpar[:, 17:18]
    p2_b = cpar[:, 18:19]; ls1 = cpar[:, 19:20]
    bn2_g = cpar[:, 20:21]; bn2_b = cpar[:, 21:22]
    fc2_b = cpar[:, 22:23]; ls2 = cpar[:, 23:24]
    dd_w = hpar[:, 0:3]          # depthwise DDConv weights (H,3)
    fc1_b = hpar[:, 3:4]; dd_b = hpar[:, 4:5]

    def batchnorm(v, g, b):
        # training-mode BatchNorm1d: per-channel stats over the (B,L) lane axis,
        # centered (two-pass) variance for numerical stability, biased var, eps=1e-5.
        mean = jnp.mean(v, axis=-1, keepdims=True)
        d = v - mean
        var = jnp.mean(d * d, axis=-1, keepdims=True)
        return d * jax.lax.rsqrt(var + 1e-5) * g + b

    def pointwise(v, w_ref, b):
        # 1x1 Conv1d == one lane-dense (O,I) x (I,N) MXU matmul; weights are already in
        # the matmul dtype (pre-cast in the wrapper), f32 accumulate.
        w = w_ref[...]
        return jnp.dot(w, v.astype(w.dtype), preferred_element_type=jnp.float32) + b

    def dwconv(v, w, b, pad, dil):
        # Depthwise Conv1d via register-resident lane rolls (XLU) + precomputed static
        # boundary masks (one VALU mul per off-center tap).  No padded VMEM scratch.
        N = v.shape[-1]
        K = w.shape[-1]
        acc = None
        for k in range(K):                       # static unrolled tap loop
            s = k * dil - pad                    # source offset (static int)
            if s == 0:
                tap = v
            else:
                row = _MASK_ROW[s]
                tap = pltpu.roll(v, shift=(-s) % N, axis=1) * masks[row:row + 1, :]
            term = w[:, k:k + 1] * tap
            acc = term if acc is None else acc + term
        return acc + b

    # ---------------- Block.forward ----------------
    n1 = batchnorm(x, bn1_g, bn1_b)                      # norm1

    # Attention
    h = pointwise(n1, p1_w_ref, p1_b)                    # proj_1
    h = _gelu_tanh(h)                                    # activation
    u = h                                                # DDCA: u = x.clone()
    a = dwconv(h, c0_w, c0_b, pad=2, dil=1)              # conv0 (dw, k=5)
    a = dwconv(a, cs_w, cs_b, pad=9, dil=3)              # conv_spatial (dw, k=7, d=3)
    a = pointwise(a, c1_w_ref, c1_b)                     # conv1 (1x1)
    h = u * a                                            # DDCA gating
    h = pointwise(h, p2_w_ref, p2_b)                     # proj_2
    attn_out = h + n1                                    # + shortcut (inside Attention)

    x1 = x + ls1 * attn_out                              # layer_scale_1, DropPath(0)=Id

    n2 = batchnorm(x1, bn2_g, bn2_b)                     # norm2

    # Mlp
    m = pointwise(n2, fc1_w_ref, fc1_b)                  # fc1 -> (H, N)
    m = dwconv(m, dd_w, dd_b, pad=1, dil=1)              # DDConv (dw, k=3)
    m = _gelu_tanh(m)                                    # act (Dropout(0)=Id)
    m = pointwise(m, fc2_w_ref, fc2_b)                   # fc2 -> (C, N)

    out_ref[...] = x1 + ls2 * m                          # layer_scale_2 + residual


def block_forward(x, params):
    B, C, L = x.shape
    N = B * L
    # Layout plumbing (outside the kernel): NCL -> channels-major (C, B*L).
    x2 = jnp.transpose(x, (1, 0, 2)).reshape(C, N).astype(jnp.float32)

    # Precomputed depthwise-conv boundary masks: row r is valid where the source
    # position pos + offset lies inside [0, L) of the same batch row. Exact for any L.
    pos = jnp.tile(jnp.arange(L, dtype=jnp.int32), B)             # (N,)
    masks = jnp.stack(
        [((pos + s >= 0) & (pos + s < L)).astype(jnp.float32) for s in _MASK_OFFSETS],
        axis=0)                                                    # (10, N)

    # Pack the small per-channel parameters into two slabs (fewer inputs / DMAs).
    cpar = jnp.concatenate(
        [params['c0_w'], params['cs_w'],
         params['bn1_g'], params['bn1_b'], params['p1_b'], params['c0_b'],
         params['cs_b'], params['c1_b'], params['p2_b'], params['ls1'],
         params['bn2_g'], params['bn2_b'], params['fc2_b'], params['ls2']],
        axis=1).astype(jnp.float32)                                # (C, 24)
    hpar = jnp.concatenate(
        [params['dd_w'], params['fc1_b'], params['dd_b']],
        axis=1).astype(jnp.float32)                                # (H, 5)

    # Pre-cast the five pointwise (matmul) weights once, outside the kernel.
    mm_dtype = jnp.bfloat16 if MATMUL_BF16 else jnp.float32
    mm_ws = [params[k].astype(mm_dtype)
             for k in ('p1_w', 'c1_w', 'p2_w', 'fc1_w', 'fc2_w')]

    args = [x2, masks, cpar, hpar] + mm_ws

    out2 = pl.pallas_call(
        block_kernel,
        out_shape=jax.ShapeDtypeStruct((C, N), jnp.float32),
        in_specs=[pl.BlockSpec(memory_space=pltpu.MemorySpace.VMEM)] * len(args),
        out_specs=pl.BlockSpec(memory_space=pltpu.MemorySpace.VMEM),
    )(*args)
    return jnp.transpose(out2.reshape(C, B, L), (1, 0, 2))


# ------------------------- pure-JAX reference (for validation) -------------------------
def block_forward_ref(x, params):
    def bn(v, g, b):
        mean = jnp.mean(v, axis=(0, 2), keepdims=True)
        var = jnp.mean((v - mean) ** 2, axis=(0, 2), keepdims=True)
        return (v - mean) * jax.lax.rsqrt(var + 1e-5) * g[None] + b[None]

    def pw(v, w, b):
        return jnp.einsum('oi,bil->bol', w, v) + b[None]

    def dw(v, w, b, pad, dil):
        _, _, Ll = v.shape
        K = w.shape[1]
        vp = jnp.pad(v, ((0, 0), (0, 0), (pad, pad)))
        acc = jnp.zeros_like(v)
        for k in range(K):
            acc = acc + w[:, k][None, :, None] * vp[:, :, k * dil:k * dil + Ll]
        return acc + b[None]

    gelu = lambda v: jax.nn.gelu(v, approximate=False)   # torch.nn.GELU() default

    n1 = bn(x, params['bn1_g'], params['bn1_b'])
    h = gelu(pw(n1, params['p1_w'], params['p1_b']))
    a = dw(h, params['c0_w'], params['c0_b'], 2, 1)
    a = dw(a, params['cs_w'], params['cs_b'], 9, 3)
    a = pw(a, params['c1_w'], params['c1_b'])
    h = h * a
    h = pw(h, params['p2_w'], params['p2_b'])
    attn = h + n1
    x1 = x + params['ls1'][None] * attn
    n2 = bn(x1, params['bn2_g'], params['bn2_b'])
    m = pw(n2, params['fc1_w'], params['fc1_b'])
    m = dw(m, params['dd_w'], params['dd_b'], 1, 1)
    m = gelu(m)
    m = pw(m, params['fc2_w'], params['fc2_b'])
    return x1 + params['ls2'][None] * m


def make_params(key, dim, mlp_ratio=4.0):
    H = int(dim * mlp_ratio)
    ks = jax.random.split(key, 20)
    n = lambda k, shape, s: s * jax.random.normal(k, shape, jnp.float32)
    return {
        # BatchNorm1d params (weight/bias), stored as (C,1) for lane broadcast
        'bn1_g': 1.0 + n(ks[0], (dim, 1), 0.1),
        'bn1_b': n(ks[1], (dim, 1), 0.1),
        # Attention: proj_1 (1x1), DDCA(conv0 dw k5, conv_spatial dw k7 d3, conv1 1x1), proj_2 (1x1)
        'p1_w': n(ks[2], (dim, dim), math.sqrt(2.0 / dim)),
        'p1_b': n(ks[3], (dim, 1), 0.02),
        'c0_w': n(ks[4], (dim, 5), math.sqrt(2.0 / 5.0)),
        'c0_b': n(ks[5], (dim, 1), 0.02),
        'cs_w': n(ks[6], (dim, 7), math.sqrt(2.0 / 7.0)),
        'cs_b': n(ks[7], (dim, 1), 0.02),
        'c1_w': n(ks[8], (dim, dim), math.sqrt(2.0 / dim)),
        'c1_b': n(ks[9], (dim, 1), 0.02),
        'p2_w': n(ks[10], (dim, dim), math.sqrt(2.0 / dim)),
        'p2_b': n(ks[11], (dim, 1), 0.02),
        'ls1': 0.01 * jnp.ones((dim, 1), jnp.float32),
        'bn2_g': 1.0 + n(ks[12], (dim, 1), 0.1),
        'bn2_b': n(ks[13], (dim, 1), 0.1),
        # Mlp: fc1 (1x1), DDConv (dw k3), fc2 (1x1)
        'fc1_w': n(ks[14], (H, dim), math.sqrt(2.0 / H)),
        'fc1_b': n(ks[15], (H, 1), 0.02),
        'dd_w': n(ks[16], (H, 3), math.sqrt(2.0 / 3.0)),
        'dd_b': n(ks[17], (H, 1), 0.02),
        'fc2_w': n(ks[18], (dim, H), math.sqrt(2.0 / dim)),
        'fc2_b': n(ks[19], (dim, 1), 0.02),
        'ls2': 0.01 * jnp.ones((dim, 1), jnp.float32),
    }


if __name__ == "__main__":
    B, C, L = 2, 4, 16          # dim=4, mlp_ratio=4 -> hidden=16
    key = jax.random.PRNGKey(0)
    kx, kp = jax.random.split(key)
    x = jax.random.normal(kx, (B, C, L), jnp.float32)
    params = make_params(kp, C, mlp_ratio=4.0)

    out = jax.block_until_ready(block_forward(x, params))
    ref = jax.block_until_ready(block_forward_ref(x, params))

    assert out.shape == (B, C, L)
    assert bool(jnp.all(jnp.isfinite(out)))
    # Loose tolerance: covers bf16 MXU rounding + tanh-GELU vs exact erf-GELU while still
    # catching structural errors (roll direction, masks, matmul layout), which are O(1).
    assert bool(jnp.allclose(out, ref, rtol=5e-2, atol=5e-2)), \
        float(jnp.max(jnp.abs(out - ref)))
    print("KERNEL_OK")
</pallas_src>

<mosaic_0001>
module attributes {stable_mosaic.version = 11 : i64} {
  func.func @block_kernel(%arg0: memref<4x32xf32, #tpu.memory_space<vmem>>, %arg1: memref<10x32xf32, #tpu.memory_space<vmem>>, %arg2: memref<4x24xf32, #tpu.memory_space<vmem>>, %arg3: memref<16x5xf32, #tpu.memory_space<vmem>>, %arg4: memref<4x4xbf16, #tpu.memory_space<vmem>>, %arg5: memref<4x4xbf16, #tpu.memory_space<vmem>>, %arg6: memref<4x4xbf16, #tpu.memory_space<vmem>>, %arg7: memref<16x4xbf16, #tpu.memory_space<vmem>>, %arg8: memref<4x16xbf16, #tpu.memory_space<vmem>>, %arg9: memref<4x32xf32, #tpu.memory_space<vmem>>) attributes {dimension_semantics = [], scalar_prefetch = 0 : i64, scratch_operands = 0 : i64, tpu.core_type = #tpu.core_type<tc>} {
    %c0 = arith.constant 0 : index
    %c0_0 = arith.constant 0 : index
    %0 = vector.load %arg0[%c0, %c0_0] : memref<4x32xf32, #tpu.memory_space<vmem>>, vector<4x32xf32>
    %c0_1 = arith.constant 0 : index
    %c0_2 = arith.constant 0 : index
    %1 = vector.load %arg1[%c0_1, %c0_2] : memref<10x32xf32, #tpu.memory_space<vmem>>, vector<10x32xf32>
    %c0_3 = arith.constant 0 : index
    %c0_4 = arith.constant 0 : index
    %2 = vector.load %arg2[%c0_3, %c0_4] : memref<4x24xf32, #tpu.memory_space<vmem>>, vector<4x24xf32>
    %c0_5 = arith.constant 0 : index
    %c0_6 = arith.constant 0 : index
    %3 = vector.load %arg3[%c0_5, %c0_6] : memref<16x5xf32, #tpu.memory_space<vmem>>, vector<16x5xf32>
    %4 = vector.extract_strided_slice %2 {offsets = [0, 0], sizes = [4, 5], strides = [1, 1]} : vector<4x24xf32> to vector<4x5xf32>
    %5 = vector.extract_strided_slice %2 {offsets = [0, 5], sizes = [4, 7], strides = [1, 1]} : vector<4x24xf32> to vector<4x7xf32>
    %6 = vector.extract_strided_slice %2 {offsets = [0, 12], sizes = [4, 1], strides = [1, 1]} : vector<4x24xf32> to vector<4x1xf32>
    %7 = vector.extract_strided_slice %2 {offsets = [0, 13], sizes = [4, 1], strides = [1, 1]} : vector<4x24xf32> to vector<4x1xf32>
    %8 = vector.extract_strided_slice %2 {offsets = [0, 14], sizes = [4, 1], strides = [1, 1]} : vector<4x24xf32> to vector<4x1xf32>
    %9 = vector.extract_strided_slice %2 {offsets = [0, 15], sizes = [4, 1], strides = [1, 1]} : vector<4x24xf32> to vector<4x1xf32>
    %10 = vector.extract_strided_slice %2 {offsets = [0, 16], sizes = [4, 1], strides = [1, 1]} : vector<4x24xf32> to vector<4x1xf32>
    %11 = vector.extract_strided_slice %2 {offsets = [0, 17], sizes = [4, 1], strides = [1, 1]} : vector<4x24xf32> to vector<4x1xf32>
    %12 = vector.extract_strided_slice %2 {offsets = [0, 18], sizes = [4, 1], strides = [1, 1]} : vector<4x24xf32> to vector<4x1xf32>
    %13 = vector.extract_strided_slice %2 {offsets = [0, 19], sizes = [4, 1], strides = [1, 1]} : vector<4x24xf32> to vector<4x1xf32>
    %14 = vector.extract_strided_slice %2 {offsets = [0, 20], sizes = [4, 1], strides = [1, 1]} : vector<4x24xf32> to vector<4x1xf32>
    %15 = vector.extract_strided_slice %2 {offsets = [0, 21], sizes = [4, 1], strides = [1, 1]} : vector<4x24xf32> to vector<4x1xf32>
    %16 = vector.extract_strided_slice %2 {offsets = [0, 22], sizes = [4, 1], strides = [1, 1]} : vector<4x24xf32> to vector<4x1xf32>
    %17 = vector.extract_strided_slice %2 {offsets = [0, 23], sizes = [4, 1], strides = [1, 1]} : vector<4x24xf32> to vector<4x1xf32>
    %18 = vector.extract_strided_slice %3 {offsets = [0, 0], sizes = [16, 3], strides = [1, 1]} : vector<16x5xf32> to vector<16x3xf32>
    %19 = vector.extract_strided_slice %3 {offsets = [0, 3], sizes = [16, 1], strides = [1, 1]} : vector<16x5xf32> to vector<16x1xf32>
    %20 = vector.extract_strided_slice %3 {offsets = [0, 4], sizes = [16, 1], strides = [1, 1]} : vector<16x5xf32> to vector<16x1xf32>
    %cst = arith.constant dense<0.000000e+00> : vector<4xf32>
    %21 = vector.multi_reduction <add>, %0, %cst [1] : vector<4x32xf32> to vector<4xf32>
    %22 = vector.shape_cast %21 : vector<4xf32> to vector<4x1xf32>
    %cst_7 = arith.constant 3.200000e+01 : f32
    %23 = vector.broadcast %cst_7 : f32 to vector<4x1xf32>
    %24 = arith.divf %22, %23 : vector<4x1xf32>
    %25 = vector.broadcast %24 : vector<4x1xf32> to vector<4x32xf32>
    %26 = arith.subf %0, %25 : vector<4x32xf32>
    %27 = arith.mulf %26, %26 : vector<4x32xf32>
    %cst_8 = arith.constant dense<0.000000e+00> : vector<4xf32>
    %28 = vector.multi_reduction <add>, %27, %cst_8 [1] : vector<4x32xf32> to vector<4xf32>
    %29 = vector.shape_cast %28 : vector<4xf32> to vector<4x1xf32>
    %cst_9 = arith.constant 3.200000e+01 : f32
    %30 = vector.broadcast %cst_9 : f32 to vector<4x1xf32>
    %31 = arith.divf %29, %30 : vector<4x1xf32>
    %cst_10 = arith.constant 9.99999974E-6 : f32
    %32 = vector.broadcast %cst_10 : f32 to vector<4x1xf32>
    %33 = arith.addf %31, %32 : vector<4x1xf32>
    %34 = math.rsqrt %33 : vector<4x1xf32>
    %35 = vector.broadcast %34 : vector<4x1xf32> to vector<4x32xf32>
    %36 = arith.mulf %26, %35 : vector<4x32xf32>
    %37 = vector.broadcast %6 : vector<4x1xf32> to vector<4x32xf32>
    %38 = arith.mulf %36, %37 : vector<4x32xf32>
    %39 = vector.broadcast %7 : vector<4x1xf32> to vector<4x32xf32>
    %40 = arith.addf %38, %39 : vector<4x32xf32>
    %c0_11 = arith.constant 0 : index
    %c0_12 = arith.constant 0 : index
    %41 = vector.load %arg4[%c0_11, %c0_12] : memref<4x4xbf16, #tpu.memory_space<vmem>>, vector<4x4xbf16>
    %42 = arith.truncf %40 : vector<4x32xf32> to vector<4x32xbf16>
    %cst_13 = arith.constant dense<0.000000e+00> : vector<4x32xf32>
    %43 = tpu.matmul %41, %42, %cst_13 {dimension_numbers = #tpu.dot_dimension_numbers<[1], [0], [0], [1], [0, 0, 1, 1], [], []>} : vector<4x4xbf16>, vector<4x32xbf16>, vector<4x32xf32> -> vector<4x32xf32>
    %44 = vector.broadcast %8 : vector<4x1xf32> to vector<4x32xf32>
    %45 = arith.addf %43, %44 : vector<4x32xf32>
    %cst_14 = arith.constant 4.471500e-02 : f32
    %46 = vector.broadcast %cst_14 : f32 to vector<4x32xf32>
    %47 = arith.mulf %46, %45 : vector<4x32xf32>
    %48 = arith.mulf %47, %45 : vector<4x32xf32>
    %49 = arith.mulf %48, %45 : vector<4x32xf32>
    %50 = arith.addf %45, %49 : vector<4x32xf32>
    %cst_15 = arith.constant 0.797884583 : f32
    %51 = vector.broadcast %cst_15 : f32 to vector<4x32xf32>
    %52 = arith.mulf %51, %50 : vector<4x32xf32>
    %cst_16 = arith.constant 5.000000e-01 : f32
    %53 = vector.broadcast %cst_16 : f32 to vector<4x32xf32>
    %54 = arith.mulf %53, %45 : vector<4x32xf32>
    %55 = math.tanh %52 : vector<4x32xf32>
    %cst_17 = arith.constant 1.000000e+00 : f32
    %56 = vector.broadcast %cst_17 : f32 to vector<4x32xf32>
    %57 = arith.addf %56, %55 : vector<4x32xf32>
    %58 = arith.mulf %54, %57 : vector<4x32xf32>
    %c2_i32 = arith.constant 2 : i32
    %59 = tpu.dynamic_rotate %58 by %c2_i32 dim 1 : vector<4x32xf32>, i32 -> vector<4x32xf32>
    %60 = vector.extract_strided_slice %1 {offsets = [3, 0], sizes = [1, 32], strides = [1, 1]} : vector<10x32xf32> to vector<1x32xf32>
    %61 = vector.broadcast %60 : vector<1x32xf32> to vector<4x32xf32>
    %62 = arith.mulf %59, %61 : vector<4x32xf32>
    %63 = vector.extract_strided_slice %4 {offsets = [0, 0], sizes = [4, 1], strides = [1, 1]} : vector<4x5xf32> to vector<4x1xf32>
    %64 = vector.broadcast %63 : vector<4x1xf32> to vector<4x32xf32>
    %65 = arith.mulf %64, %62 : vector<4x32xf32>
    %c1_i32 = arith.constant 1 : i32
    %66 = tpu.dynamic_rotate %58 by %c1_i32 dim 1 : vector<4x32xf32>, i32 -> vector<4x32xf32>
    %67 = vector.extract_strided_slice %1 {offsets = [4, 0], sizes = [1, 32], strides = [1, 1]} : vector<10x32xf32> to vector<1x32xf32>
    %68 = vector.broadcast %67 : vector<1x32xf32> to vector<4x32xf32>
    %69 = arith.mulf %66, %68 : vector<4x32xf32>
    %70 = vector.extract_strided_slice %4 {offsets = [0, 1], sizes = [4, 1], strides = [1, 1]} : vector<4x5xf32> to vector<4x1xf32>
    %71 = vector.broadcast %70 : vector<4x1xf32> to vector<4x32xf32>
    %72 = arith.mulf %71, %69 : vector<4x32xf32>
    %73 = arith.addf %65, %72 : vector<4x32xf32>
    %74 = vector.extract_strided_slice %4 {offsets = [0, 2], sizes = [4, 1], strides = [1, 1]} : vector<4x5xf32> to vector<4x1xf32>
    %75 = vector.broadcast %74 : vector<4x1xf32> to vector<4x32xf32>
    %76 = arith.mulf %75, %58 : vector<4x32xf32>
    %77 = arith.addf %73, %76 : vector<4x32xf32>
    %c31_i32 = arith.constant 31 : i32
    %78 = tpu.dynamic_rotate %58 by %c31_i32 dim 1 : vector<4x32xf32>, i32 -> vector<4x32xf32>
    %79 = vector.extract_strided_slice %1 {offsets = [5, 0], sizes = [1, 32], strides = [1, 1]} : vector<10x32xf32> to vector<1x32xf32>
    %80 = vector.broadcast %79 : vector<1x32xf32> to vector<4x32xf32>
    %81 = arith.mulf %78, %80 : vector<4x32xf32>
    %82 = vector.extract_strided_slice %4 {offsets = [0, 3], sizes = [4, 1], strides = [1, 1]} : vector<4x5xf32> to vector<4x1xf32>
    %83 = vector.broadcast %82 : vector<4x1xf32> to vector<4x32xf32>
    %84 = arith.mulf %83, %81 : vector<4x32xf32>
    %85 = arith.addf %77, %84 : vector<4x32xf32>
    %c30_i32 = arith.constant 30 : i32
    %86 = tpu.dynamic_rotate %58 by %c30_i32 dim 1 : vector<4x32xf32>, i32 -> vector<4x32xf32>
    %87 = vector.extract_strided_slice %1 {offsets = [6, 0], sizes = [1, 32], strides = [1, 1]} : vector<10x32xf32> to vector<1x32xf32>
    %88 = vector.broadcast %87 : vector<1x32xf32> to vector<4x32xf32>
    %89 = arith.mulf %86, %88 : vector<4x32xf32>
    %90 = vector.extract_strided_slice %4 {offsets = [0, 4], sizes = [4, 1], strides = [1, 1]} : vector<4x5xf32> to vector<4x1xf32>
    %91 = vector.broadcast %90 : vector<4x1xf32> to vector<4x32xf32>
    %92 = arith.mulf %91, %89 : vector<4x32xf32>
    %93 = arith.addf %85, %92 : vector<4x32xf32>
    %94 = vector.broadcast %9 : vector<4x1xf32> to vector<4x32xf32>
    %95 = arith.addf %93, %94 : vector<4x32xf32>
    %c9_i32 = arith.constant 9 : i32
    %96 = tpu.dynamic_rotate %95 by %c9_i32 dim 1 : vector<4x32xf32>, i32 -> vector<4x32xf32>
    %97 = vector.extract_strided_slice %1 {offsets = [0, 0], sizes = [1, 32], strides = [1, 1]} : vector<10x32xf32> to vector<1x32xf32>
    %98 = vector.broadcast %97 : vector<1x32xf32> to vector<4x32xf32>
    %99 = arith.mulf %96, %98 : vector<4x32xf32>
    %100 = vector.extract_strided_slice %5 {offsets = [0, 0], sizes = [4, 1], strides = [1, 1]} : vector<4x7xf32> to vector<4x1xf32>
    %101 = vector.broadcast %100 : vector<4x1xf32> to vector<4x32xf32>
    %102 = arith.mulf %101, %99 : vector<4x32xf32>
    %c6_i32 = arith.constant 6 : i32
    %103 = tpu.dynamic_rotate %95 by %c6_i32 dim 1 : vector<4x32xf32>, i32 -> vector<4x32xf32>
    %104 = vector.extract_strided_slice %1 {offsets = [1, 0], sizes = [1, 32], strides = [1, 1]} : vector<10x32xf32> to vector<1x32xf32>
    %105 = vector.broadcast %104 : vector<1x32xf32> to vector<4x32xf32>
    %106 = arith.mulf %103, %105 : vector<4x32xf32>
    %107 = vector.extract_strided_slice %5 {offsets = [0, 1], sizes = [4, 1], strides = [1, 1]} : vector<4x7xf32> to vector<4x1xf32>
    %108 = vector.broadcast %107 : vector<4x1xf32> to vector<4x32xf32>
    %109 = arith.mulf %108, %106 : vector<4x32xf32>
    %110 = arith.addf %102, %109 : vector<4x32xf32>
    %c3_i32 = arith.constant 3 : i32
    %111 = tpu.dynamic_rotate %95 by %c3_i32 dim 1 : vector<4x32xf32>, i32 -> vector<4x32xf32>
    %112 = vector.extract_strided_slice %1 {offsets = [2, 0], sizes = [1, 32], strides = [1, 1]} : vector<10x32xf32> to vector<1x32xf32>
    %113 = vector.broadcast %112 : vector<1x32xf32> to vector<4x32xf32>
    %114 = arith.mulf %111, %113 : vector<4x32xf32>
    %115 = vector.extract_strided_slice %5 {offsets = [0, 2], sizes = [4, 1], strides = [1, 1]} : vector<4x7xf32> to vector<4x1xf32>
    %116 = vector.broadcast %115 : vector<4x1xf32> to vector<4x32xf32>
    %117 = arith.mulf %116, %114 : vector<4x32xf32>
    %118 = arith.addf %110, %117 : vector<4x32xf32>
    %119 = vector.extract_strided_slice %5 {offsets = [0, 3], sizes = [4, 1], strides = [1, 1]} : vector<4x7xf32> to vector<4x1xf32>
    %120 = vector.broadcast %119 : vector<4x1xf32> to vector<4x32xf32>
    %121 = arith.mulf %120, %95 : vector<4x32xf32>
    %122 = arith.addf %118, %121 : vector<4x32xf32>
    %c29_i32 = arith.constant 29 : i32
    %123 = tpu.dynamic_rotate %95 by %c29_i32 dim 1 : vector<4x32xf32>, i32 -> vector<4x32xf32>
    %124 = vector.extract_strided_slice %1 {offsets = [7, 0], sizes = [1, 32], strides = [1, 1]} : vector<10x32xf32> to vector<1x32xf32>
    %125 = vector.broadcast %124 : vector<1x32xf32> to vector<4x32xf32>
    %126 = arith.mulf %123, %125 : vector<4x32xf32>
    %127 = vector.extract_strided_slice %5 {offsets = [0, 4], sizes = [4, 1], strides = [1, 1]} : vector<4x7xf32> to vector<4x1xf32>
    %128 = vector.broadcast %127 : vector<4x1xf32> to vector<4x32xf32>
    %129 = arith.mulf %128, %126 : vector<4x32xf32>
    %130 = arith.addf %122, %129 : vector<4x32xf32>
    %c26_i32 = arith.constant 26 : i32
    %131 = tpu.dynamic_rotate %95 by %c26_i32 dim 1 : vector<4x32xf32>, i32 -> vector<4x32xf32>
    %132 = vector.extract_strided_slice %1 {offsets = [8, 0], sizes = [1, 32], strides = [1, 1]} : vector<10x32xf32> to vector<1x32xf32>
    %133 = vector.broadcast %132 : vector<1x32xf32> to vector<4x32xf32>
    %134 = arith.mulf %131, %133 : vector<4x32xf32>
    %135 = vector.extract_strided_slice %5 {offsets = [0, 5], sizes = [4, 1], strides = [1, 1]} : vector<4x7xf32> to vector<4x1xf32>
    %136 = vector.broadcast %135 : vector<4x1xf32> to vector<4x32xf32>
    %137 = arith.mulf %136, %134 : vector<4x32xf32>
    %138 = arith.addf %130, %137 : vector<4x32xf32>
    %c23_i32 = arith.constant 23 : i32
    %139 = tpu.dynamic_rotate %95 by %c23_i32 dim 1 : vector<4x32xf32>, i32 -> vector<4x32xf32>
    %140 = vector.extract_strided_slice %1 {offsets = [9, 0], sizes = [1, 32], strides = [1, 1]} : vector<10x32xf32> to vector<1x32xf32>
    %141 = vector.broadcast %140 : vector<1x32xf32> to vector<4x32xf32>
    %142 = arith.mulf %139, %141 : vector<4x32xf32>
    %143 = vector.extract_strided_slice %5 {offsets = [0, 6], sizes = [4, 1], strides = [1, 1]} : vector<4x7xf32> to vector<4x1xf32>
    %144 = vector.broadcast %143 : vector<4x1xf32> to vector<4x32xf32>
    %145 = arith.mulf %144, %142 : vector<4x32xf32>
    %146 = arith.addf %138, %145 : vector<4x32xf32>
    %147 = vector.broadcast %10 : vector<4x1xf32> to vector<4x32xf32>
    %148 = arith.addf %146, %147 : vector<4x32xf32>
    %c0_18 = arith.constant 0 : index
    %c0_19 = arith.constant 0 : index
    %149 = vector.load %arg5[%c0_18, %c0_19] : memref<4x4xbf16, #tpu.memory_space<vmem>>, vector<4x4xbf16>
    %150 = arith.truncf %148 : vector<4x32xf32> to vector<4x32xbf16>
    %cst_20 = arith.constant dense<0.000000e+00> : vector<4x32xf32>
    %151 = tpu.matmul %149, %150, %cst_20 {dimension_numbers = #tpu.dot_dimension_numbers<[1], [0], [0], [1], [0, 0, 1, 1], [], []>} : vector<4x4xbf16>, vector<4x32xbf16>, vector<4x32xf32> -> vector<4x32xf32>
    %152 = vector.broadcast %11 : vector<4x1xf32> to vector<4x32xf32>
    %153 = arith.addf %151, %152 : vector<4x32xf32>
    %154 = arith.mulf %58, %153 : vector<4x32xf32>
    %c0_21 = arith.constant 0 : index
    %c0_22 = arith.constant 0 : index
    %155 = vector.load %arg6[%c0_21, %c0_22] : memref<4x4xbf16, #tpu.memory_space<vmem>>, vector<4x4xbf16>
    %156 = arith.truncf %154 : vector<4x32xf32> to vector<4x32xbf16>
    %cst_23 = arith.constant dense<0.000000e+00> : vector<4x32xf32>
    %157 = tpu.matmul %155, %156, %cst_23 {dimension_numbers = #tpu.dot_dimension_numbers<[1], [0], [0], [1], [0, 0, 1, 1], [], []>} : vector<4x4xbf16>, vector<4x32xbf16>, vector<4x32xf32> -> vector<4x32xf32>
    %158 = vector.broadcast %12 : vector<4x1xf32> to vector<4x32xf32>
    %159 = arith.addf %157, %158 : vector<4x32xf32>
    %160 = arith.addf %159, %40 : vector<4x32xf32>
    %161 = vector.broadcast %13 : vector<4x1xf32> to vector<4x32xf32>
    %162 = arith.mulf %161, %160 : vector<4x32xf32>
    %163 = arith.addf %0, %162 : vector<4x32xf32>
    %cst_24 = arith.constant dense<0.000000e+00> : vector<4xf32>
    %164 = vector.multi_reduction <add>, %163, %cst_24 [1] : vector<4x32xf32> to vector<4xf32>
    %165 = vector.shape_cast %164 : vector<4xf32> to vector<4x1xf32>
    %cst_25 = arith.constant 3.200000e+01 : f32
    %166 = vector.broadcast %cst_25 : f32 to vector<4x1xf32>
    %167 = arith.divf %165, %166 : vector<4x1xf32>
    %168 = vector.broadcast %167 : vector<4x1xf32> to vector<4x32xf32>
    %169 = arith.subf %163, %168 : vector<4x32xf32>
    %170 = arith.mulf %169, %169 : vector<4x32xf32>
    %cst_26 = arith.constant dense<0.000000e+00> : vector<4xf32>
    %171 = vector.multi_reduction <add>, %170, %cst_26 [1] : vector<4x32xf32> to vector<4xf32>
    %172 = vector.shape_cast %171 : vector<4xf32> to vector<4x1xf32>
    %cst_27 = arith.constant 3.200000e+01 : f32
    %173 = vector.broadcast %cst_27 : f32 to vector<4x1xf32>
    %174 = arith.divf %172, %173 : vector<4x1xf32>
    %cst_28 = arith.constant 9.99999974E-6 : f32
    %175 = vector.broadcast %cst_28 : f32 to vector<4x1xf32>
    %176 = arith.addf %174, %175 : vector<4x1xf32>
    %177 = math.rsqrt %176 : vector<4x1xf32>
    %178 = vector.broadcast %177 : vector<4x1xf32> to vector<4x32xf32>
    %179 = arith.mulf %169, %178 : vector<4x32xf32>
    %180 = vector.broadcast %14 : vector<4x1xf32> to vector<4x32xf32>
    %181 = arith.mulf %179, %180 : vector<4x32xf32>
    %182 = vector.broadcast %15 : vector<4x1xf32> to vector<4x32xf32>
    %183 = arith.addf %181, %182 : vector<4x32xf32>
    %c0_29 = arith.constant 0 : index
    %c0_30 = arith.constant 0 : index
    %184 = vector.load %arg7[%c0_29, %c0_30] : memref<16x4xbf16, #tpu.memory_space<vmem>>, vector<16x4xbf16>
    %185 = arith.truncf %183 : vector<4x32xf32> to vector<4x32xbf16>
    %cst_31 = arith.constant dense<0.000000e+00> : vector<16x32xf32>
    %186 = tpu.matmul %184, %185, %cst_31 {dimension_numbers = #tpu.dot_dimension_numbers<[1], [0], [0], [1], [0, 0, 1, 1], [], []>} : vector<16x4xbf16>, vector<4x32xbf16>, vector<16x32xf32> -> vector<16x32xf32>
    %187 = vector.broadcast %19 : vector<16x1xf32> to vector<16x32xf32>
    %188 = arith.addf %186, %187 : vector<16x32xf32>
    %c1_i32_32 = arith.constant 1 : i32
    %189 = tpu.dynamic_rotate %188 by %c1_i32_32 dim 1 : vector<16x32xf32>, i32 -> vector<16x32xf32>
    %190 = vector.extract_strided_slice %1 {offsets = [4, 0], sizes = [1, 32], strides = [1, 1]} : vector<10x32xf32> to vector<1x32xf32>
    %191 = vector.broadcast %190 : vector<1x32xf32> to vector<16x32xf32>
    %192 = arith.mulf %189, %191 : vector<16x32xf32>
    %193 = vector.extract_strided_slice %18 {offsets = [0, 0], sizes = [16, 1], strides = [1, 1]} : vector<16x3xf32> to vector<16x1xf32>
    %194 = vector.broadcast %193 : vector<16x1xf32> to vector<16x32xf32>
    %195 = arith.mulf %194, %192 : vector<16x32xf32>
    %196 = vector.extract_strided_slice %18 {offsets = [0, 1], sizes = [16, 1], strides = [1, 1]} : vector<16x3xf32> to vector<16x1xf32>
    %197 = vector.broadcast %196 : vector<16x1xf32> to vector<16x32xf32>
    %198 = arith.mulf %197, %188 : vector<16x32xf32>
    %199 = arith.addf %195, %198 : vector<16x32xf32>
    %c31_i32_33 = arith.constant 31 : i32
    %200 = tpu.dynamic_rotate %188 by %c31_i32_33 dim 1 : vector<16x32xf32>, i32 -> vector<16x32xf32>
    %201 = vector.extract_strided_slice %1 {offsets = [5, 0], sizes = [1, 32], strides = [1, 1]} : vector<10x32xf32> to vector<1x32xf32>
    %202 = vector.broadcast %201 : vector<1x32xf32> to vector<16x32xf32>
    %203 = arith.mulf %200, %202 : vector<16x32xf32>
    %204 = vector.extract_strided_slice %18 {offsets = [0, 2], sizes = [16, 1], strides = [1, 1]} : vector<16x3xf32> to vector<16x1xf32>
    %205 = vector.broadcast %204 : vector<16x1xf32> to vector<16x32xf32>
    %206 = arith.mulf %205, %203 : vector<16x32xf32>
    %207 = arith.addf %199, %206 : vector<16x32xf32>
    %208 = vector.broadcast %20 : vector<16x1xf32> to vector<16x32xf32>
    %209 = arith.addf %207, %208 : vector<16x32xf32>
    %cst_34 = arith.constant 4.471500e-02 : f32
    %210 = vector.broadcast %cst_34 : f32 to vector<16x32xf32>
    %211 = arith.mulf %210, %209 : vector<16x32xf32>
    %212 = arith.mulf %211, %209 : vector<16x32xf32>
    %213 = arith.mulf %212, %209 : vector<16x32xf32>
    %214 = arith.addf %209, %213 : vector<16x32xf32>
    %cst_35 = arith.constant 0.797884583 : f32
    %215 = vector.broadcast %cst_35 : f32 to vector<16x32xf32>
    %216 = arith.mulf %215, %214 : vector<16x32xf32>
    %cst_36 = arith.constant 5.000000e-01 : f32
    %217 = vector.broadcast %cst_36 : f32 to vector<16x32xf32>
    %218 = arith.mulf %217, %209 : vector<16x32xf32>
    %219 = math.tanh %216 : vector<16x32xf32>
    %cst_37 = arith.constant 1.000000e+00 : f32
    %220 = vector.broadcast %cst_37 : f32 to vector<16x32xf32>
    %221 = arith.addf %220, %219 : vector<16x32xf32>
    %222 = arith.mulf %218, %221 : vector<16x32xf32>
    %c0_38 = arith.constant 0 : index
    %c0_39 = arith.constant 0 : index
    %223 = vector.load %arg8[%c0_38, %c0_39] : memref<4x16xbf16, #tpu.memory_space<vmem>>, vector<4x16xbf16>
    %224 = arith.truncf %222 : vector<16x32xf32> to vector<16x32xbf16>
    %cst_40 = arith.constant dense<0.000000e+00> : vector<4x32xf32>
    %225 = tpu.matmul %223, %224, %cst_40 {dimension_numbers = #tpu.dot_dimension_numbers<[1], [0], [0], [1], [0, 0, 1, 1], [], []>} : vector<4x16xbf16>, vector<16x32xbf16>, vector<4x32xf32> -> vector<4x32xf32>
    %226 = vector.broadcast %16 : vector<4x1xf32> to vector<4x32xf32>
    %227 = arith.addf %225, %226 : vector<4x32xf32>
    %228 = vector.broadcast %17 : vector<4x1xf32> to vector<4x32xf32>
    %229 = arith.mulf %228, %227 : vector<4x32xf32>
    %230 = arith.addf %163, %229 : vector<4x32xf32>
    %c0_41 = arith.constant 0 : index
    %c0_42 = arith.constant 0 : index
    %231 = vector.load %arg9[%c0_41, %c0_42] : memref<4x32xf32, #tpu.memory_space<vmem>>, vector<4x32xf32>
    tpu.vector_store %arg9[%c0_41, %c0_42], %230 {strides = array<i32>} : memref<4x32xf32, #tpu.memory_space<vmem>>, vector<4x32xf32>,
    return
  }
}

</mosaic_0001>

<bundles_post_ra>
// kernel: tpu_custom_call.1
= control target key start
LH: loop header
LB: loop body
LE: loop exit
PB: predicated region body
PF: predicated region fallthrough
CT: control target
= control target key end

     0   :  { %vm40_vm0 = vcmask 257024   ;;  %s1176_s0 = inlined_call_operand.vmem [shape: f32[4,32], index: 0, kind: input, shape index: {}]   ;;  %s1177_s1 = inlined_call_operand.vmem [shape: f32[10,32], index: 1, kind: input, shape index: {}]   ;;  %s1178_s2 = inlined_call_operand.vmem [shape: f32[4,24], index: 2, kind: input, shape index: {}]   ;;  %s1179_s3 = inlined_call_operand.vmem [shape: f32[16,5], index: 3, kind: input, shape index: {}]   ;;  %s1180_s4 = inlined_call_operand.vmem [shape: bf16[4,4], index: 4, kind: input, shape index: {}]   ;;  %s1181_s5 = inlined_call_operand.vmem [shape: bf16[4,4], index: 5, kind: input, shape index: {}]   ;;  %s1182_s6 = inlined_call_operand.vmem [shape: bf16[4,4], index: 6, kind: input, shape index: {}]   ;;  %s1183_s7 = inlined_call_operand.vmem [shape: bf16[16,4], index: 7, kind: input, shape index: {}]   ;;  %s1184_s8 = inlined_call_operand.vmem [shape: bf16[4,16], index: 8, kind: input, shape index: {}]   ;;  %s1185_s9 = inlined_call_operand.hbm [shape: f32[4,32], index: 9, kind: output, shape index: {}]  }
   0x1   :  { %v991_v0 = vld [vmem:[%s1176_s0] sm:$0xf] }
   0x2   :  { %v41_v1 = vsel %vm40_vm0, %v991_v0, 0.0 }
   0x3   :  { %14 = vsyncpa [#allocation3], 0  ;;  %42 = vadd.xlane.f32.xlu0 %v41_v1  ;;  %v998_v2 = vld [vmem:[%s1178_s2] sm:$0xf]  ;;  %v889_v3 = vmov 12   ;;  %v890_v4 = vmov 13   ;;  %v136_v40 = vlaneseq }
   0x4   :  { %823 = vset.pattern.permute.xlu1 %v889_v3  ;;  %v891_v10 = vmov 0.0   ;;  %vm892_vm1 = vmmov 0   ;;  %v893_v11 = vmov 14   ;;  %vm76_vm2 = vcmask 1041408   ;;  %v66_v23 = vld [vmem:[%s1180_s4] sm:$0x3] }
   0x5   :  { %57 = vperm.xlu1 %823, %v998_v2   ;;  %744 = vmatprep.subr.bf16.mxu0 %v891_v10  ;;  %vm72_vm3 = vcmask 31744   ;;  %v894_v24 = vmov 1   ;;  %s895_s4 = smov 32   ;;  %v1029_v41 = vshrl.u32 %v136_v40, 7  ;;  %v896_v42 = vmov 2   ;;  %v1037_v44 = vld [vmem:[%s1177_s1] sm:$0xff] }
   0x6   :  { %750 = vmatprep.subr.bf16.mxu1 %v891_v10  ;;  %746 = vmatprep.mubr.msk.bf16.mxu0 %vm892_vm1, %v891_v10  ;;  %v897_v45 = vmov 3   ;;  %s898_s15 = smov 31   ;;  %v899_v47 = vmov 4   ;;  %v900_v48 = vmov 0   ;;  %vm129_vm4 = vcmask 1047808   ;;  %s901_s16 = smov 1  }
   0x7   :  { %752 = vmatprep.mubr.msk.bf16.mxu1 %vm892_vm1, %v891_v10  ;;  %825 = vset.pattern.permute.xlu0 %v893_v11  ;;  %v152_v43 = vsub.s32 4, %v1029_v41  ;;  %v181_v49 = vsub.s32 5, %v1029_v41  ;;  %v200_v53 = vsub.s32 6, %v1029_v41  ;;  %s902_s17 = smov 2   ;;  %v138_v55 = vsub.s32 3, %v1029_v41  ;;  %s903_s18 = smov 30  }
   0x8   :  { %v904_v57 = vmov 15   ;;  %s905_s19 = smov 127   ;;  %s907_s20 = smov 29   ;;  %v915_v40 = vmov 11   ;;  %vm663_vm5 = vcmask 130048  }
   0x9   :  { %824 = vset.pattern.permute.xlu1 %v890_v4  ;;  %v153_v46 = vrot.slane %v1037_v44, %v152_v43  ;;  %v182_v52 = vrot.slane %v1037_v44, %v181_v49  ;;  %v201_v54 = vrot.slane %v1037_v44, %v200_v53  ;;  %v139_v56 = vrot.slane %v1037_v44, %v138_v55  ;;  %s908_s21 = smov 28   ;;  %s909_s22 = smov 98   ;;  %v36_v43 = vld [vmem:[%s1177_s1 + $0x8] sm:$0x3] }
   0xa   :  { %62 = vperm.xlu1 %824, %v998_v2   ;;  %s914_s23 = smov 26   ;;  %v234_v49 = vsub.s32 0, %v1029_v41  ;;  %s916_s26 = smov 9  }
   0xb   :  { %s917_s27 = smov 23   ;;  %s919_s1 = smov 3  }
   0xc   :  { %s921_s28 = smov 6   ;;  %s922_s29 = smov 121  }
   0xd   :  { %s923_s30 = smov 125   ;;  %s924_s10 = smov 122  }
   0xe   :  { %826 = vset.pattern.permute.xlu1 %v894_v24  ;;  %s925_s11 = smov 14   ;;  %s926_s12 = smov 20  }
   0xf   :  { %s927_s0 = smov 17   ;;  %s929_s2 = smov 105  }
  0x84   :  { %v58_v15 = vpop.permute.xlu1 %57 }
  0x89   :  { %v63_v18 = vpop.permute.xlu1 %62 }
  0x90   :  { %v43_v5 = vpop.xlane.xlu0 %42 }
  0x91   :  { %v45_v6 = vmul.f32 0.03125, %v43_v5 }
  0x93   :  { %v46_v7 = vsub.f32 %v991_v0, %v45_v6 }
  0x95   :  { %v47_v8 = vmul.f32 %v46_v7, %v46_v7 }
  0x97   :  { %v48_v9 = vsel %vm40_vm0, %v47_v8, 0.0 }
  0x98   :  { %49 = vadd.xlane.f32.xlu0 %v48_v9 }
  0xae   :  { %69 = vperm.xlu0 %825, %v998_v2  }
 0x125   :  { %v50_v12 = vpop.xlane.xlu0 %49 }
 0x126   :  { %v51_v13 = vmul.f32 0.03125, %v50_v12 }
 0x128   :  { %v52_v14 = vadd.f32 1e-05, %v51_v13 }
 0x12a   :  { %855 = vrsqrt.f32 %v52_v14 }
 0x12d   :  { %v70_v25 = vpop.permute.xlu0 %69 }
 0x134   :  { %v856_v16 = vpop.eup %855 }
 0x135   :  { %v54_v17 = vmul.f32 %v856_v16, %v46_v7  ;;  %v906_v7 = vmov 6  }
 0x137   :  { %v60_v19 = vmul.f32 %v58_v15, %v54_v17 }
 0x139   :  { %v1011_v20 = vadd.f32 %v63_v18, %v60_v19 }
 0x13b   :  { %v67_v21 = vpack.c.bf16 %v1011_v20, %v1011_v20 }
 0x13d   :  { %v78_v22 = vsel %vm76_vm2, %v67_v21, 0 }
 0x13e   :  { %745 = vmatpush3.bf16.msra.mxu0 %v78_v22 }
 0x13f   :  { %756 = vmatprep.subr.bf16.mxu0 %v891_v10 }
 0x141   :  { %747 = vmatmul.mubr.msk.bf16.vlgmr.msra.gmra.mrb[0].mxu0 %vm72_vm3, %v66_v23 }
 0x142   :  { %758 = vmatprep.mubr.msk.bf16.mxu0 %vm892_vm1, %v891_v10 }
 0x214   :  { %v114_v26 = vpop.f32.mrb[0].mxu0 }
 0x215   :  { %v115_v27 = vadd.f32 %v114_v26, %v70_v25  ;;  %v748_v28 = vpop.f32.mrb[1].mxu0 }
 0x216   :  { %v117_v29 = vpop.f32.mrb[2].mxu0 }
 0x217   :  { %v120_v30 = vmul.f32 0.044715, %v115_v27  ;;  %v749_v31 = vpop.f32.mrb[3].mxu0  ;;  %v125_v37 = vmul.f32 0.5, %v115_v27 }
 0x218   :  { %v911_v31 = vmov 7  }
 0x219   :  { %v121_v32 = vmul.f32 %v120_v30, %v115_v27  ;;  %v910_v30 = vmov 8   ;;  %833 = vset.pattern.permute.xlu0 %v911_v31 }
 0x21b   :  { %v122_v33 = vmul.f32 %v121_v32, %v115_v27  ;;  %v912_v32 = vmov 9  }
 0x21d   :  { %v123_v34 = vadd.f32 %v122_v33, %v115_v27  ;;  %v913_v33 = vmov 10  }
 0x21f   :  { %v124_v35 = vmul.f32 0.7978846, %v123_v34 }
 0x221   :  { %857 = vtanh.f32 %v124_v35  ;;  %v248_v35 = vsub.s32 1, %v1029_v41 }
 0x22b   :  { %v858_v36 = vpop.eup %857 }
 0x22c   :  { %v127_v38 = vadd.f32 1.0, %v858_v36  ;;  %v249_v36 = vrot.slane %v1037_v44, %v248_v35 }
 0x22e   :  { %v1024_v39 = vmul.f32 %v127_v38, %v125_v37  ;;  %v267_v37 = vsub.s32 2, %v1029_v41 }
 0x230   :  { %130 = vrot.lane.b32.xlu1 %v1024_v39, %s895_s4  ;;  %v268_v38 = vrot.slane %v1037_v44, %v267_v37 }
 0x234   :  { %160 = vperm.xlu1 %826, %v998_v2  }
 0x238   :  { %827 = vset.pattern.permute.xlu1 %v896_v42 }
 0x239   :  { %170 = vperm.xlu1 %827, %v998_v2  }
 0x23d   :  { %828 = vset.pattern.permute.xlu1 %v897_v45 }
 0x23e   :  { %189 = vperm.xlu1 %828, %v998_v2  }
 0x242   :  { %155 = vrot.lane.b32.xlu1 %v153_v46, %s898_s15  ;;  %v335_v46 = vrot.slane %v36_v43, %v248_v35 }
 0x243   :  { %829 = vset.pattern.permute.xlu1 %v899_v47 }
 0x246   :  { %208 = vperm.xlu1 %829, %v998_v2  }
 0x24a   :  { %830 = vset.pattern.permute.xlu1 %v900_v48 }
 0x2a2   :  { %v131_v50 = vpop.permute.xlu1 %130 }
 0x2a3   :  { %v132_v51 = vsel %vm129_vm4, %v131_v50, %v1024_v39  ;;  %v235_v50 = vrot.slane %v1037_v44, %v234_v49 }
 0x2a4   :  { %133 = vrot.lane.b32.xlu1 %v132_v51, %s895_s4  ;;  %v918_v51 = vmov 16  }
 0x2a8   :  { %184 = vrot.lane.b32.xlu1 %v182_v52, %s901_s16 }
 0x2ac   :  { %203 = vrot.lane.b32.xlu1 %v201_v54, %s902_s17  ;;  %v296_v54 = vsub.s32 7, %v1029_v41 }
 0x2ae   :  { %v297_v55 = vrot.slane %v1037_v44, %v296_v54  ;;  %v931_v54 = vmov 19  }
 0x2b0   :  { %146 = vperm.xlu1 %830, %v998_v2  }
 0x2b3   :  { %v161_v58 = vpop.permute.xlu1 %160 }
 0x2b4   :  { %141 = vrot.lane.b32.xlu1 %v139_v56, %s903_s18  ;;  %v316_v56 = vrot.slane %v36_v43, %v234_v49 }
 0x2b5   :  { %831 = vset.pattern.permute.xlu1 %v904_v57 }
 0x2b8   :  { %218 = vperm.xlu1 %831, %v998_v2   ;;  %v171_v59 = vpop.permute.xlu1 %170 }
 0x2b9   :  { %v173_v9 = vmul.f32 %v171_v59, %v1024_v39 }
 0x2bc   :  { %832 = vset.pattern.permute.xlu1 %v906_v7 }
 0x2bd   :  { %v190_v60 = vpop.permute.xlu1 %189 }
 0x2c1   :  { %v1058_v61 = vpop.permute.xlu1 %155 }
 0x2c5   :  { %v209_v62 = vpop.permute.xlu1 %208 }
 0x316   :  { %v134_v63 = vpop.permute.xlu1 %133 }
 0x317   :  { %v135_v1 = vsel %vm129_vm4, %v134_v63, %v1024_v39 }
 0x318   :  { %v158_v3 = vmul.f32 %v1058_v61, %v135_v1 }
 0x31a   :  { %v1063_v4 = vpop.permute.xlu1 %184  ;;  %v163_v5 = vmul.f32 %v161_v58, %v158_v3  ;;  %v920_v58 = vmov 5  }
 0x31b   :  { %v187_v6 = vmul.f32 %v1063_v4, %v135_v1 }
 0x31c   :  { %165 = vrot.lane.b32.xlu0 %v163_v5, %s905_s19 }
 0x31d   :  { %v192_v8 = vmul.f32 %v190_v60, %v187_v6 }
 0x31e   :  { %v204_v11 = vpop.permute.xlu1 %203 }
 0x31f   :  { %v206_v12 = vmul.f32 %v204_v11, %v135_v1  ;;  %194 = vrot.lane.b32.xlu1 %v192_v8, %s907_s20 }
 0x320   :  { %175 = vrot.lane.b32.xlu0 %v173_v9, %s903_s18 }
 0x321   :  { %v211_v13 = vmul.f32 %v209_v62, %v206_v12 }
 0x324   :  { %213 = vrot.lane.b32.xlu0 %v211_v13, %s908_s21 }
 0x32f   :  { %v147_v14 = vpop.permute.xlu1 %146 }
 0x333   :  { %v142_v15 = vpop.permute.xlu1 %141 }
 0x334   :  { %v144_v16 = vmul.f32 %v142_v15, %v135_v1 }
 0x336   :  { %v149_v19 = vmul.f32 %v147_v14, %v144_v16 }
 0x337   :  { %v219_v17 = vpop.permute.xlu1 %218 }
 0x38e   :  { %v166_v18 = vpop.permute.xlu0 %165 }
 0x38f   :  { %v168_v21 = vadd.f32 %v166_v18, %v149_v19 }
 0x391   :  { %v195_v25 = vpop.permute.xlu1 %194 }
 0x392   :  { %v176_v22 = vpop.permute.xlu0 %175 }
 0x393   :  { %v178_v23 = vadd.f32 %v176_v22, %v168_v21 }
 0x395   :  { %v197_v26 = vadd.f32 %v195_v25, %v178_v23 }
 0x396   :  { %v214_v27 = vpop.permute.xlu0 %213 }
 0x397   :  { %v216_v28 = vadd.f32 %v214_v27, %v197_v26 }
 0x399   :  { %v221_v29 = vadd.f32 %v219_v17, %v216_v28 }
 0x39b   :  { %223 = vrot.lane.b32.xlu1 %v221_v29, %s909_s22 }
 0x39f   :  { %256 = vperm.xlu1 %832, %v998_v2  }
 0x3a3   :  { %834 = vset.pattern.permute.xlu1 %v910_v30 }
 0x3a4   :  { %285 = vperm.xlu1 %834, %v998_v2  }
 0x3a8   :  { %835 = vset.pattern.permute.xlu1 %v912_v32 }
 0x3a9   :  { %304 = vperm.xlu1 %835, %v998_v2  }
 0x3ad   :  { %836 = vset.pattern.permute.xlu1 %v913_v33 }
 0x40d   :  { %v224_v34 = vpop.permute.xlu1 %223 }
 0x40e   :  { %226 = vrot.lane.b32.xlu0 %v224_v34, %s895_s4 }
 0x412   :  { %275 = vperm.xlu0 %833, %v998_v2  }
 0x416   :  { %251 = vrot.lane.b32.xlu0 %v249_v36, %s914_s23 }
 0x417   :  { %837 = vset.pattern.permute.xlu0 %v915_v40 }
 0x41a   :  { %270 = vrot.lane.b32.xlu0 %v268_v38, %s907_s20  ;;  %v928_v38 = vmov 17  }
 0x41e   :  { %342 = vperm.xlu0 %837, %v998_v2   ;;  %v257_v57 = vpop.permute.xlu1 %256 }
 0x422   :  { %337 = vrot.lane.b32.xlu0 %v335_v46, %s916_s26 }
 0x423   :  { %839 = vset.pattern.permute.xlu0 %v918_v51  ;;  %v286_v59 = vpop.permute.xlu1 %285 }
 0x424   :  { %v288_v60 = vmul.f32 %v286_v59, %v221_v29 }
 0x426   :  { %237 = vrot.lane.b32.xlu0 %v235_v50, %s917_s27 }
 0x428   :  { %v305_v63 = vpop.permute.xlu1 %304 }
 0x480   :  { %v227_v52 = vpop.permute.xlu0 %226 }
 0x481   :  { %v228_v53 = vsel %vm129_vm4, %v227_v52, %v224_v34  ;;  %v356_v52 = vld [vmem:[%s1181_s5] sm:$0x3] }
 0x482   :  { %229 = vrot.lane.b32.xlu1 %v228_v53, %s895_s4  ;;  %v930_v53 = vmov 18  }
 0x486   :  { %323 = vperm.xlu1 %836, %v998_v2  }
 0x48a   :  { %299 = vrot.lane.b32.xlu1 %v297_v55, %s919_s1 }
 0x48b   :  { %838 = vset.pattern.permute.xlu1 %v920_v58 }
 0x48e   :  { %318 = vrot.lane.b32.xlu1 %v316_v56, %s921_s28 }
 0x491   :  { %v276_v62 = vpop.permute.xlu0 %275 }
 0x492   :  { %242 = vperm.xlu1 %838, %v998_v2  }
 0x495   :  { %v252_v41 = vpop.permute.xlu0 %251 }
 0x496   :  { %290 = vrot.lane.b32.xlu1 %v288_v60, %s922_s29 }
 0x497   :  { %841 = vset.pattern.permute.xlu1 %v930_v53 }
 0x499   :  { %v271_v1 = vpop.permute.xlu0 %270 }
 0x49d   :  { %v343_v44 = vpop.permute.xlu0 %342 }
 0x4a1   :  { %v338_v11 = vpop.permute.xlu0 %337 }
 0x4a5   :  { %v238_v23 = vpop.permute.xlu0 %237 }
 0x4f4   :  { %v230_v3 = vpop.permute.xlu1 %229 }
 0x4f5   :  { %v231_v5 = vsel %vm129_vm4, %v230_v3, %v224_v34 }
 0x4f6   :  { %v254_v6 = vmul.f32 %v252_v41, %v231_v5  ;;  %v273_v7 = vmul.f32 %v271_v1, %v231_v5  ;;  %v340_v12 = vmul.f32 %v338_v11, %v231_v5  ;;  %v240_v26 = vmul.f32 %v238_v23, %v231_v5  ;;  %v412_v1 = vld [vmem:[%s1182_s6] sm:$0x3] }
 0x4f8   :  { %v259_v8 = vmul.f32 %v257_v57, %v254_v6  ;;  %v278_v9 = vmul.f32 %v276_v62, %v273_v7  ;;  %v345_v13 = vmul.f32 %v343_v44, %v340_v12 }
 0x4fa   :  { %261 = vrot.lane.b32.xlu1 %v259_v8, %s923_s30  ;;  %280 = vrot.lane.b32.xlu0 %v278_v9, %s924_s10 }
 0x4fe   :  { %352 = vperm.xlu0 %839, %v998_v2  }
 0x502   :  { %347 = vrot.lane.b32.xlu0 %v345_v13, %s925_s11 }
 0x503   :  { %840 = vset.pattern.permute.xlu0 %v928_v38 }
 0x505   :  { %v324_v14 = vpop.permute.xlu1 %323 }
 0x506   :  { %359 = vperm.xlu0 %840, %v998_v2  }
 0x509   :  { %v300_v15 = vpop.permute.xlu1 %299 }
 0x50a   :  { %v302_v16 = vmul.f32 %v300_v15, %v231_v5 }
 0x50c   :  { %v307_v17 = vmul.f32 %v305_v63, %v302_v16 }
 0x50d   :  { %v319_v18 = vpop.permute.xlu1 %318 }
 0x50e   :  { %v321_v19 = vmul.f32 %v319_v18, %v231_v5  ;;  %309 = vrot.lane.b32.xlu1 %v307_v17, %s926_s12  ;;  %v38_v18 = vld [vmem:[%s1179_s3] sm:$0xff] }
 0x510   :  { %v326_v21 = vmul.f32 %v324_v14, %v321_v19  ;;  %v932_v14 = vmov 20   ;;  %v39_v19 = vld [vmem:[%s1179_s3 + $0x8] sm:$0xff] }
 0x511   :  { %v243_v22 = vpop.permute.xlu1 %242  ;;  %843 = vset.pattern.permute.xlu0 %v932_v14 }
 0x512   :  { %328 = vrot.lane.b32.xlu1 %v326_v21, %s927_s0  ;;  %v245_v28 = vmul.f32 %v243_v22, %v240_v26 }
 0x515   :  { %v291_v25 = vpop.permute.xlu1 %290 }
 0x56c   :  { %v262_v27 = vpop.permute.xlu1 %261  ;;  %v281_v30 = vpop.permute.xlu0 %280 }
 0x56d   :  { %v264_v29 = vadd.f32 %v262_v27, %v245_v28 }
 0x56f   :  { %v283_v31 = vadd.f32 %v281_v30, %v264_v29 }
 0x571   :  { %v293_v34 = vadd.f32 %v291_v25, %v283_v31 }
 0x57d   :  { %v353_v32 = vpop.permute.xlu0 %352 }
 0x580   :  { %v310_v33 = vpop.permute.xlu1 %309 }
 0x581   :  { %v312_v35 = vadd.f32 %v310_v33, %v293_v34  ;;  %v348_v40 = vpop.permute.xlu0 %347 }
 0x584   :  { %v329_v36 = vpop.permute.xlu1 %328 }
 0x585   :  { %v331_v37 = vadd.f32 %v329_v36, %v312_v35  ;;  %v360_v55 = vpop.permute.xlu0 %359 }
 0x587   :  { %v350_v43 = vadd.f32 %v348_v40, %v331_v37 }
 0x589   :  { %v355_v46 = vadd.f32 %v353_v32, %v350_v43  ;;  %v854_v32 = vld [vmem:[%s1183_s7] sm:$0xff]   ;;  %s936_s7 = smov 97  }
 0x58b   :  { %v357_v49 = vpack.c.bf16 %v355_v46, %v355_v46 }
 0x58d   :  { %363 = vrot.lane.b32.xlu1 %v357_v49, %s929_s2 }
 0x591   :  { %415 = vperm.xlu1 %841, %v998_v2  }
 0x595   :  { %842 = vset.pattern.permute.xlu1 %v931_v54 }
 0x596   :  { %466 = vperm.xlu1 %842, %v998_v2  }
 0x5ff   :  { %v364_v50 = vpop.permute.xlu1 %363 }
 0x600   :  { %v369_v51 = vsel %vm76_vm2, %v364_v50, 0 }
 0x601   :  { %751 = vmatpush3.bf16.msra.mxu1 %v369_v51 }
 0x602   :  { %762 = vmatprep.subr.bf16.mxu1 %v891_v10 }
 0x604   :  { %753 = vmatmul.mubr.msk.bf16.vlgmr.msra.gmra.mrb[0].mxu1 %vm72_vm3, %v356_v52 }
 0x605   :  { %764 = vmatprep.mubr.msk.bf16.mxu1 %vm892_vm1, %v891_v10 }
 0x610   :  { %v416_v3 = vpop.permute.xlu1 %415 }
 0x615   :  { %v467_v7 = vpop.permute.xlu1 %466 }
 0x6d7   :  { %v405_v56 = vpop.f32.mrb[0].mxu1 }
 0x6d8   :  { %v406_v57 = vadd.f32 %v405_v56, %v360_v55  ;;  %v754_v58 = vpop.f32.mrb[1].mxu1 }
 0x6d9   :  { %v408_v59 = vpop.f32.mrb[2].mxu1 }
 0x6da   :  { %v411_v60 = vmul.f32 %v406_v57, %v1024_v39  ;;  %v755_v62 = vpop.f32.mrb[3].mxu1 }
 0x6dc   :  { %v413_v41 = vpack.c.bf16 %v411_v60, %v411_v60 }
 0x6de   :  { %v422_v63 = vsel %vm76_vm2, %v413_v41, 0 }
 0x6df   :  { %757 = vmatpush3.bf16.msra.mxu0 %v422_v63 }
 0x6e0   :  { %768 = vmatprep.subr.bf16.mxu0 %v891_v10 }
 0x6e2   :  { %759 = vmatmul.mubr.msk.bf16.vlgmr.msra.gmra.mrb[4].mxu0 %vm72_vm3, %v412_v1 }
 0x6e3   :  { %770 = vmatprep.mubr.msk.bf16.mxu0 %vm892_vm1, %v891_v10  ;;  %v933_v10 = vmov 21  }
 0x6e4   :  { %844 = vset.pattern.permute.xlu1 %v933_v10 }
 0x7b5   :  { %v458_v44 = vpop.f32.mrb[4].mxu0 }
 0x7b6   :  { %v459_v5 = vadd.f32 %v458_v44, %v416_v3  ;;  %v760_v39 = vpop.f32.mrb[5].mxu0 }
 0x7b7   :  { %v461_v6 = vpop.f32.mrb[6].mxu0 }
 0x7b8   :  { %v761_v8 = vpop.f32.mrb[7].mxu0  ;;  %v464_v9 = vadd.f32 %v459_v5, %v1011_v20 }
 0x7ba   :  { %v469_v11 = vmul.f32 %v467_v7, %v464_v9 }
 0x7bc   :  { %v1115_v12 = vadd.f32 %v469_v11, %v991_v0 }
 0x7be   :  { %v471_v13 = vsel %vm40_vm0, %v1115_v12, 0.0 }
 0x7bf   :  { %472 = vadd.xlane.f32.xlu0 %v471_v13 }
 0x7d5   :  { %485 = vperm.xlu0 %843, %v998_v2  }
 0x7d9   :  { %847 = vset.pattern.permute.xlu0 %v896_v42 }
 0x7da   :  { %606 = vperm.xlu0 %847, %v38_v18  }
 0x7de   :  { %850 = vset.pattern.permute.xlu0 %v900_v48 }
 0x84c   :  { %v473_v15 = vpop.xlane.xlu0 %472 }
 0x84d   :  { %v474_v16 = vmul.f32 0.03125, %v473_v15 }
 0x84f   :  { %v475_v20 = vsub.f32 %v1115_v12, %v474_v16 }
 0x851   :  { %v476_v17 = vmul.f32 %v475_v20, %v475_v20 }
 0x853   :  { %v477_v0 = vsel %vm40_vm0, %v476_v17, 0.0 }
 0x854   :  { %478 = vadd.xlane.f32.xlu1 %v477_v0  ;;  %v486_v25 = vpop.permute.xlu0 %485 }
 0x859   :  { %v607_v54 = vpop.permute.xlu0 %606 }
 0x865   :  { %490 = vperm.xlu1 %844, %v998_v2  }
 0x869   :  { %845 = vset.pattern.permute.xlu1 %v897_v45 }
 0x86a   :  { %499 = vperm.xlu1 %845, %v38_v18  }
 0x86e   :  { %504 = vperm.xlu1 %845, %v39_v19  }
 0x872   :  { %846 = vset.pattern.permute.xlu1 %v894_v24 }
 0x8e1   :  { %v479_v21 = vpop.xlane.xlu1 %478 }
 0x8e2   :  { %v480_v22 = vmul.f32 0.03125, %v479_v21 }
 0x8e4   :  { %v481_v23 = vadd.f32 1e-05, %v480_v22 }
 0x8e5   :  { %v491_v27 = vpop.permute.xlu1 %490 }
 0x8e6   :  { %859 = vrsqrt.f32 %v481_v23 }
 0x8e9   :  { %v500_v24 = vpop.permute.xlu1 %499 }
 0x8ed   :  { %v505_v38 = vpop.permute.xlu1 %504 }
 0x8f0   :  { %v860_v45 = vpop.eup %859 }
 0x8f1   :  { %v483_v26 = vmul.f32 %v860_v45, %v475_v20 }
 0x8f3   :  { %v488_v28 = vmul.f32 %v486_v25, %v483_v26  ;;  %v934_v26 = vmov 22  }
 0x8f5   :  { %v493_v29 = vadd.f32 %v491_v27, %v488_v28  ;;  %v935_v27 = vmov 23  }
 0x8f7   :  { %v496_v30 = vpack.c.bf16 %v493_v29, %v493_v29 }
 0x8f9   :  { %v516_v31 = vsel %vm76_vm2, %v496_v30, 0 }
 0x8fa   :  { %763 = vmatpush3.bf16.msra.mxu1 %v516_v31 }
 0x8fd   :  { %765 = vmatmul.mubr.msk.bf16.vlgmr.msra.gmra.mrb[4].mxu1 %vm72_vm3, %v854_v32 }
 0x9d0   :  { %v552_v33 = vpop.f32.mrb[4].mxu1 }
 0x9d1   :  { %v553_v34 = vadd.f32 %v552_v33, %v500_v24  ;;  %v766_v35 = vpop.f32.mrb[5].mxu1 }
 0x9d2   :  { %v555_v36 = vpop.f32.mrb[6].mxu1 }
 0x9d3   :  { %559 = vrot.lane.b32.xlu1 %v553_v34, %s895_s4  ;;  %v767_v37 = vpop.f32.mrb[7].mxu1  ;;  %v556_v40 = vadd.f32 %v555_v36, %v505_v38  ;;  %v653_v36 = vld [vmem:[%s1184_s8] sm:$0x3] }
 0x9d7   :  { %562 = vrot.lane.b32.xlu1 %v556_v40, %s895_s4 }
 0x9db   :  { %584 = vperm.xlu1 %846, %v38_v18  }
 0x9df   :  { %588 = vperm.xlu1 %846, %v39_v19  }
 0x9e3   :  { %848 = vset.pattern.permute.xlu1 %v896_v42 }
 0x9e4   :  { %610 = vperm.xlu1 %848, %v39_v19  }
 0x9e8   :  { %849 = vset.pattern.permute.xlu1 %v900_v48 }
 0xa45   :  { %v560_v43 = vpop.permute.xlu1 %559 }
 0xa46   :  { %v561_v46 = vsel %vm129_vm4, %v560_v43, %v553_v34 }
 0xa47   :  { %565 = vrot.lane.b32.xlu1 %v561_v46, %s895_s4 }
 0xa49   :  { %v563_v49 = vpop.permute.xlu1 %562 }
 0xa4a   :  { %v564_v50 = vsel %vm129_vm4, %v563_v49, %v556_v40 }
 0xa4b   :  { %574 = vperm.xlu1 %849, %v38_v18   ;;  %567 = vrot.lane.b32.xlu0 %v564_v50, %s895_s4 }
 0xa4f   :  { %851 = vset.pattern.permute.xlu1 %v899_v47  ;;  %578 = vperm.xlu0 %850, %v39_v19  }
 0xa50   :  { %626 = vperm.xlu1 %851, %v38_v18  }
 0xa53   :  { %853 = vset.pattern.permute.xlu0 %v935_v27 }
 0xa54   :  { %630 = vperm.xlu1 %851, %v39_v19  }
 0xa58   :  { %852 = vset.pattern.permute.xlu1 %v934_v26 }
 0xa5a   :  { %v585_v42 = vpop.permute.xlu1 %584 }
 0xa5b   :  { %v591_v51 = vmul.f32 %v585_v42, %v553_v34 }
 0xa5d   :  { %595 = vrot.lane.b32.xlu0 %v591_v51, %s898_s15 }
 0xa5e   :  { %v589_v48 = vpop.permute.xlu1 %588 }
 0xa5f   :  { %v592_v52 = vmul.f32 %v589_v48, %v556_v40 }
 0xa61   :  { %597 = vrot.lane.b32.xlu1 %v592_v52, %s898_s15 }
 0xa63   :  { %v611_v53 = vpop.permute.xlu1 %610 }
 0xab9   :  { %v566_v55 = vpop.permute.xlu1 %565 }
 0xaba   :  { %v569_v56 = vsel %vm129_vm4, %v566_v55, %v553_v34 }
 0xabb   :  { %v603_v57 = vmul.f32 %v569_v56, %v1063_v4  ;;  %v571_v44 = vmul.f32 %v569_v56, %v1058_v61 }
 0xabd   :  { %v613_v58 = vmul.f32 %v607_v54, %v603_v57  ;;  %v568_v47 = vpop.permute.xlu0 %567 }
 0xabe   :  { %v570_v59 = vsel %vm129_vm4, %v568_v47, %v556_v40 }
 0xabf   :  { %v604_v60 = vmul.f32 %v570_v59, %v1063_v4  ;;  %617 = vrot.lane.b32.xlu0 %v613_v58, %s903_s18  ;;  %v572_v6 = vmul.f32 %v570_v59, %v1058_v61 }
 0xac1   :  { %v614_v62 = vmul.f32 %v611_v53, %v604_v60 }
 0xac3   :  { %619 = vrot.lane.b32.xlu1 %v614_v62, %s903_s18  ;;  %s937_s18 = smov [#allocation2]  }
 0xac4   :  { %s720_s22 = sshll.u32 %s937_s18, 4  ;;  %s721_s22 = int_to_ptr.vmem [resolvable:$true] %s720_s22 }
 0xac5   :  { %s865_s23 = scalar_lea.vmem %s721_s22, 64  ;;  %p870_p1 = scmp.lt.s32.totalorder %s721_s22, %s721_s22 }
 0xac6   :  { %p866_p0 = scmp.ne.s32.totalorder %s721_s22, %s865_s23  ;;  %p871_p2 = scmp.lt.s32.totalorder %s865_s23, %s865_s23 }
 0xac7   :  { %656 = vperm.xlu1 %852, %v998_v2  }
 0xac8   :  { %p872_p3 = por %p871_p2, %p870_p1 }
 0xaca   :  { %v575_v41 = vpop.permute.xlu1 %574  ;;  %p873_p4 = pnand %p872_p3, %p866_p0 }
 0xacb   :  { %v581_v39 = vmul.f32 %v575_v41, %v571_v44 }
 0xace   :  { %v579_v1 = vpop.permute.xlu0 %578 }
 0xacf   :  { %v627_v63 = vpop.permute.xlu1 %626  ;;  %v582_v11 = vmul.f32 %v579_v1, %v572_v6 }
 0xad2   :  { %v596_v5 = vpop.permute.xlu0 %595 }
 0xad3   :  { %v631_v3 = vpop.permute.xlu1 %630  ;;  %v601_v7 = vadd.f32 %v596_v5, %v581_v39 }
 0xad7   :  { %v598_v8 = vpop.permute.xlu1 %597 }
 0xad8   :  { %v602_v13 = vadd.f32 %v598_v8, %v582_v11 }
 0xb31   :  { %v618_v9 = vpop.permute.xlu0 %617 }
 0xb32   :  { %v623_v4 = vadd.f32 %v618_v9, %v601_v7 }
 0xb34   :  { %v633_v14 = vadd.f32 %v627_v63, %v623_v4 }
 0xb35   :  { %v620_v10 = vpop.permute.xlu1 %619 }
 0xb36   :  { %v635_v15 = vmul.f32 0.044715, %v633_v14  ;;  %v624_v16 = vadd.f32 %v620_v10, %v602_v13  ;;  %v645_v30 = vmul.f32 0.5, %v633_v14 }
 0xb38   :  { %v637_v20 = vmul.f32 %v635_v15, %v633_v14  ;;  %v634_v17 = vadd.f32 %v631_v3, %v624_v16 }
 0xb3a   :  { %v636_v0 = vmul.f32 0.044715, %v634_v17  ;;  %v639_v18 = vmul.f32 %v637_v20, %v633_v14  ;;  %v646_v31 = vmul.f32 0.5, %v634_v17 }
 0xb3c   :  { %v638_v19 = vmul.f32 %v636_v0, %v634_v17  ;;  %v641_v21 = vadd.f32 %v639_v18, %v633_v14 }
 0xb3e   :  { %v640_v22 = vmul.f32 %v638_v19, %v634_v17  ;;  %v643_v23 = vmul.f32 0.7978846, %v641_v21 }
 0xb40   :  { %v642_v45 = vadd.f32 %v640_v22, %v634_v17  ;;  %861 = vtanh.f32 %v643_v23 }
 0xb42   :  { %v644_v61 = vmul.f32 0.7978846, %v642_v45 }
 0xb44   :  { %863 = vtanh.f32 %v644_v61 }
 0xb46   :  { %v657_v37 = vpop.permute.xlu1 %656 }
 0xb4a   :  { %v862_v25 = vpop.eup %861 }
 0xb4b   :  { %v649_v28 = vadd.f32 1.0, %v862_v25 }
 0xb4d   :  { %v651_v24 = vmul.f32 %v649_v28, %v645_v30 }
 0xb4e   :  { %v864_v29 = vpop.eup %863 }
 0xb4f   :  { %v650_v32 = vadd.f32 1.0, %v864_v29 }
 0xb51   :  { %v652_v33 = vmul.f32 %v650_v32, %v646_v31 }
 0xb53   :  { %v654_v34 = vpack.c.bf16 %v652_v33, %v651_v24 }
 0xb55   :  { %660 = vrot.lane.b32.xlu0 %v654_v34, %s936_s7 }
 0xb59   :  { %708 = vperm.xlu0 %853, %v998_v2  }
 0xbc7   :  { %v661_v35 = vpop.permute.xlu0 %660 }
 0xbc8   :  { %769 = vmatpush3.bf16.msra.mxu0 %v661_v35 }
 0xbcb   :  { %771 = vmatmul.mubr.msk.bf16.vlgmr.msra.gmra.mrb[8].mxu0 %vm663_vm5, %v653_v36 }
 0xbd8   :  { %v709_v40 = vpop.permute.xlu0 %708 }
 0xc9e   :  { %v701_v38 = vpop.f32.mrb[8].mxu0 }
 0xc9f   :  { %v702_v43 = vadd.f32 %v701_v38, %v657_v37  ;;  %v772_v46 = vpop.f32.mrb[9].mxu0 }
 0xca0   :  { %v704_v49 = vpop.f32.mrb[10].mxu0 }
 0xca1   :  { %v711_v50 = vmul.f32 %v709_v40, %v702_v43  ;;  %v773_v42 = vpop.f32.mrb[11].mxu0 }
 0xca3   :  { %v712_v2 = vadd.f32 %v711_v50, %v1115_v12 }
 0xca5   :  { %713 = vst.msk [vmem:[#allocation2] sm:$0xf] %vm40_vm0, %v712_v2 }
 0xca6   :  { %876 = shalt.err (!%p873_p4)
}
 0xca7   :  { %s877_s25 = scalar_lea.hbm %s1185_s9, 64 }
 0xca8   :  { %p878_p5 = scmp.ne.s32.totalorder %s1185_s9, %s877_s25  ;;  %p881_p6 = scmp.lt.u32.totalorder %s877_s25, %s1185_s9 }
 0xcaa   :  { %p883_p7 = pnand %p881_p6, %p878_p5 }
 0xcac   :  { %886 = shalt.err (!%p883_p7)
}
 0xcad   :  { %723 = dma.vmem_to_hbm [thread:$0]  %s721_s22, 64, %s1185_s9, [#allocation3]  }
 0xcae   :  { %887 = dma.done.wait [#allocation3], 64  }
 0xcaf   :  { %888 = vsyncadd [#allocation3], 4294967232 }
 0xcb0   :  { %727 = vsyncpa [#allocation3], 1 }

</bundles_post_ra>
